<compile_context>
chip_gen: v6e
topology: v6e:2x2x1
jax: 0.10.0
libtpu: 0.0.40
codegen_flags: <defaults>
</compile_context>

<pallas_src>
import jax
import jax.numpy as jnp
from jax.experimental import pallas as pl
from jax.experimental.pallas import tpu as pltpu


def _round_up(a, m):
    return ((a + m - 1) // m) * m


def _mlp_t_kernel(x_ref, w1_ref, b1_ref, w2_ref, b2_ref, w3_ref, b3_ref, o_ref):
    # x_ref:  (2*nX, TILE_B)    activations, batch on lanes (lane-dense)
    # w*_ref: PyTorch (out, in) layout, used directly
    # b*_ref: (out, 1), broadcast over the lane (batch) axis
    x = x_ref[...]
    h1 = jnp.tanh(
        jnp.dot(w1_ref[...], x, preferred_element_type=jnp.float32) + b1_ref[...]
    )
    h2 = jnp.tanh(
        jnp.dot(w2_ref[...], h1, preferred_element_type=jnp.float32) + b2_ref[...]
    )
    o_ref[...] = (
        jnp.dot(w3_ref[...], h2, preferred_element_type=jnp.float32) + b3_ref[...]
    ).astype(o_ref.dtype)


def prepare_params(params):
    """One-time layout prep (hoisted out of the per-call hot path).

    Weights stay in PyTorch (out, in) layout; biases become (out, 1) columns
    so they broadcast over the lane/batch axis inside the kernel.
    """
    return {
        "w1": params["w1"],
        "w2": params["w2"],
        "w3": params["w3"],
        "b1": params["b1"][:, None],
        "b2": params["b2"][:, None],
        "b3": params["b3"][:, None],
    }


def mog_netE_forward(x, prepared, *, tile_b=2048):
    """x: (B, 2*nX) float32.  prepared: output of prepare_params()."""
    B, in_feat = x.shape
    nz = prepared["w3"].shape[0]

    # Effective batch tile: multiple of 128 (lane width), capped at tile_b.
    tb = min(tile_b, _round_up(B, 128))
    b_pad = _round_up(B, tb)
    n_tiles = b_pad // tb

    # Transpose + pad batch onto the lane axis: (in_feat, B_pad).
    # (Layout plumbing only — fuses under jit; the model data volume is tiny.)
    x_t = jnp.pad(x, ((0, b_pad - B), (0, 0))).T

    def const_spec(shape):
        # Block index never changes -> Pallas keeps these VMEM-resident
        # (no re-DMA across the batch grid).
        return pl.BlockSpec(shape, lambda i: (0, 0))

    out_t = pl.pallas_call(
        _mlp_t_kernel,
        out_shape=jax.ShapeDtypeStruct((nz, b_pad), jnp.float32),
        grid=(n_tiles,),
        in_specs=[
            pl.BlockSpec((in_feat, tb), lambda i: (0, i)),   # x^T, streamed
            const_spec(prepared["w1"].shape),
            const_spec(prepared["b1"].shape),
            const_spec(prepared["w2"].shape),
            const_spec(prepared["b2"].shape),
            const_spec(prepared["w3"].shape),
            const_spec(prepared["b3"].shape),
        ],
        out_specs=pl.BlockSpec((nz, tb), lambda i: (0, i)),   # lane-dense out
        compiler_params=pltpu.CompilerParams(
            dimension_semantics=("parallel",),
        ),
    )(
        x_t,
        prepared["w1"],
        prepared["b1"],
        prepared["w2"],
        prepared["b2"],
        prepared["w3"],
        prepared["b3"],
    )

    # Back to the PyTorch output convention: (B, nz).
    return out_t[:, :B].T


def init_params(key, nX, dim, nz):
    """Deterministic init mimicking nn.Linear's uniform(-1/sqrt(fan_in), ...)."""

    def linear(k, fan_in, fan_out):
        kw, kb = jax.random.split(k)
        bound = 1.0 / jnp.sqrt(fan_in)
        w = jax.random.uniform(kw, (fan_out, fan_in), jnp.float32, -bound, bound)
        b = jax.random.uniform(kb, (fan_out,), jnp.float32, -bound, bound)
        return w, b

    k1, k2, k3 = jax.random.split(key, 3)
    w1, b1 = linear(k1, 2 * nX, dim)
    w2, b2 = linear(k2, dim, dim)
    w3, b3 = linear(k3, dim, nz)
    return {"w1": w1, "b1": b1, "w2": w2, "b2": b2, "w3": w3, "b3": b3}


def reference_forward(x, p):
    h1 = jnp.tanh(x @ p["w1"].T + p["b1"])
    h2 = jnp.tanh(h1 @ p["w2"].T + p["b2"])
    return h2 @ p["w3"].T + p["b3"]


if __name__ == "__main__":
    # TODO(synk): the nn.parallel.data_parallel (ngpu > 1) branch has no Pallas
    # equivalent here; only the sequential forward path is implemented.
    nX = 2      # module-level constant from the source file
    dim = 32    # hidden width
    nz = 8      # latent size
    batch = 200  # non-multiple of the tile: exercises batch tiling + padding

    key = jax.random.PRNGKey(0)
    kx, kp = jax.random.split(key)
    x = jax.random.normal(kx, (batch, 2 * nX), jnp.float32)
    params = init_params(kp, nX, dim, nz)
    prepared = prepare_params(params)

    # tile_b=128 so the small demo batch still runs a multi-step grid;
    # production use would keep the default tile_b=2048.
    fwd = jax.jit(lambda xx: mog_netE_forward(xx, prepared, tile_b=128))
    out = fwd(x)
    out = jax.block_until_ready(out)

    ref = reference_forward(x, params)
    assert out.shape == (batch, nz), out.shape
    assert jnp.allclose(out, ref, atol=1e-5, rtol=1e-5), "mismatch vs reference"

    print("KERNEL_OK")
</pallas_src>

<mosaic_0001>
module attributes {stable_mosaic.version = 11 : i64} {
  func.func @_mlp_t_kernel(%arg0: i32, %arg1: memref<4x128xf32, #tpu.memory_space<vmem>>, %arg2: memref<32x4xf32, #tpu.memory_space<vmem>>, %arg3: memref<32x1xf32, #tpu.memory_space<vmem>>, %arg4: memref<32x32xf32, #tpu.memory_space<vmem>>, %arg5: memref<32x1xf32, #tpu.memory_space<vmem>>, %arg6: memref<8x32xf32, #tpu.memory_space<vmem>>, %arg7: memref<8x1xf32, #tpu.memory_space<vmem>>, %arg8: memref<8x128xf32, #tpu.memory_space<vmem>>) attributes {dimension_semantics = [#tpu.dimension_semantics<parallel>], iteration_bounds = array<i64: 2>, scalar_prefetch = 0 : i64, scratch_operands = 0 : i64, tpu.core_type = #tpu.core_type<tc>, window_params = [{transform_indices = @transform_0, window_bounds = array<i64: 4, 128>}, {pipeline_mode = #tpu.pipeline_mode<synchronous>, transform_indices = @transform_1, window_bounds = array<i64: 32, 4>}, {pipeline_mode = #tpu.pipeline_mode<synchronous>, transform_indices = @transform_2, window_bounds = array<i64: 32, 1>}, {pipeline_mode = #tpu.pipeline_mode<synchronous>, transform_indices = @transform_3, window_bounds = array<i64: 32, 32>}, {pipeline_mode = #tpu.pipeline_mode<synchronous>, transform_indices = @transform_4, window_bounds = array<i64: 32, 1>}, {pipeline_mode = #tpu.pipeline_mode<synchronous>, transform_indices = @transform_5, window_bounds = array<i64: 8, 32>}, {pipeline_mode = #tpu.pipeline_mode<synchronous>, transform_indices = @transform_6, window_bounds = array<i64: 8, 1>}, {transform_indices = @transform_7, window_bounds = array<i64: 8, 128>}]} {
    %c0 = arith.constant 0 : index
    %c0_0 = arith.constant 0 : index
    %0 = vector.load %arg1[%c0, %c0_0] : memref<4x128xf32, #tpu.memory_space<vmem>>, vector<4x128xf32>
    %c0_1 = arith.constant 0 : index
    %c0_2 = arith.constant 0 : index
    %1 = vector.load %arg2[%c0_1, %c0_2] : memref<32x4xf32, #tpu.memory_space<vmem>>, vector<32x4xf32>
    %cst = arith.constant dense<0.000000e+00> : vector<32x128xf32>
    %2 = tpu.matmul %1, %0, %cst {dimension_numbers = #tpu.dot_dimension_numbers<[1], [0], [0], [1], [0, 0, 1, 1], [], []>} : vector<32x4xf32>, vector<4x128xf32>, vector<32x128xf32> -> vector<32x128xf32>
    %c0_3 = arith.constant 0 : index
    %c0_4 = arith.constant 0 : index
    %3 = vector.load %arg3[%c0_3, %c0_4] : memref<32x1xf32, #tpu.memory_space<vmem>>, vector<32x1xf32>
    %4 = vector.broadcast %3 : vector<32x1xf32> to vector<32x128xf32>
    %5 = arith.addf %2, %4 : vector<32x128xf32>
    %6 = math.tanh %5 : vector<32x128xf32>
    %c0_5 = arith.constant 0 : index
    %c0_6 = arith.constant 0 : index
    %7 = vector.load %arg4[%c0_5, %c0_6] : memref<32x32xf32, #tpu.memory_space<vmem>>, vector<32x32xf32>
    %cst_7 = arith.constant dense<0.000000e+00> : vector<32x128xf32>
    %8 = tpu.matmul %7, %6, %cst_7 {dimension_numbers = #tpu.dot_dimension_numbers<[1], [0], [0], [1], [0, 0, 1, 1], [], []>} : vector<32x32xf32>, vector<32x128xf32>, vector<32x128xf32> -> vector<32x128xf32>
    %c0_8 = arith.constant 0 : index
    %c0_9 = arith.constant 0 : index
    %9 = vector.load %arg5[%c0_8, %c0_9] : memref<32x1xf32, #tpu.memory_space<vmem>>, vector<32x1xf32>
    %10 = vector.broadcast %9 : vector<32x1xf32> to vector<32x128xf32>
    %11 = arith.addf %8, %10 : vector<32x128xf32>
    %12 = math.tanh %11 : vector<32x128xf32>
    %c0_10 = arith.constant 0 : index
    %c0_11 = arith.constant 0 : index
    %13 = vector.load %arg6[%c0_10, %c0_11] : memref<8x32xf32, #tpu.memory_space<vmem>>, vector<8x32xf32>
    %cst_12 = arith.constant dense<0.000000e+00> : vector<8x128xf32>
    %14 = tpu.matmul %13, %12, %cst_12 {dimension_numbers = #tpu.dot_dimension_numbers<[1], [0], [0], [1], [0, 0, 1, 1], [], []>} : vector<8x32xf32>, vector<32x128xf32>, vector<8x128xf32> -> vector<8x128xf32>
    %c0_13 = arith.constant 0 : index
    %c0_14 = arith.constant 0 : index
    %15 = vector.load %arg7[%c0_13, %c0_14] : memref<8x1xf32, #tpu.memory_space<vmem>>, vector<8x1xf32>
    %16 = vector.broadcast %15 : vector<8x1xf32> to vector<8x128xf32>
    %17 = arith.addf %14, %16 : vector<8x128xf32>
    %c0_15 = arith.constant 0 : index
    %c0_16 = arith.constant 0 : index
    %18 = vector.load %arg8[%c0_15, %c0_16] : memref<8x128xf32, #tpu.memory_space<vmem>>, vector<8x128xf32>
    tpu.vector_store %arg8[%c0_15, %c0_16], %17 {strides = array<i32>} : memref<8x128xf32, #tpu.memory_space<vmem>>, vector<8x128xf32>,
    return
  }
  func.func @transform_0(%arg0: i32) -> (i32, i32) {
    %c0_i32 = arith.constant 0 : i32
    %c0_i32_0 = arith.constant 0 : i32
    return %c0_i32, %arg0 : i32, i32
  }
  func.func @transform_1(%arg0: i32) -> (i32, i32) {
    %c0_i32 = arith.constant 0 : i32
    %c0_i32_0 = arith.constant 0 : i32
    %c0_i32_1 = arith.constant 0 : i32
    return %c0_i32, %c0_i32_0 : i32, i32
  }
  func.func @transform_2(%arg0: i32) -> (i32, i32) {
    %c0_i32 = arith.constant 0 : i32
    %c0_i32_0 = arith.constant 0 : i32
    %c0_i32_1 = arith.constant 0 : i32
    return %c0_i32, %c0_i32_0 : i32, i32
  }
  func.func @transform_3(%arg0: i32) -> (i32, i32) {
    %c0_i32 = arith.constant 0 : i32
    %c0_i32_0 = arith.constant 0 : i32
    %c0_i32_1 = arith.constant 0 : i32
    return %c0_i32, %c0_i32_0 : i32, i32
  }
  func.func @transform_4(%arg0: i32) -> (i32, i32) {
    %c0_i32 = arith.constant 0 : i32
    %c0_i32_0 = arith.constant 0 : i32
    %c0_i32_1 = arith.constant 0 : i32
    return %c0_i32, %c0_i32_0 : i32, i32
  }
  func.func @transform_5(%arg0: i32) -> (i32, i32) {
    %c0_i32 = arith.constant 0 : i32
    %c0_i32_0 = arith.constant 0 : i32
    %c0_i32_1 = arith.constant 0 : i32
    return %c0_i32, %c0_i32_0 : i32, i32
  }
  func.func @transform_6(%arg0: i32) -> (i32, i32) {
    %c0_i32 = arith.constant 0 : i32
    %c0_i32_0 = arith.constant 0 : i32
    %c0_i32_1 = arith.constant 0 : i32
    return %c0_i32, %c0_i32_0 : i32, i32
  }
  func.func @transform_7(%arg0: i32) -> (i32, i32) {
    %c0_i32 = arith.constant 0 : i32
    %c0_i32_0 = arith.constant 0 : i32
    return %c0_i32, %arg0 : i32, i32
  }
}

</mosaic_0001>

<bundles_post_ra>
// kernel: _lambda_.1
= control target key start
LH: loop header
LB: loop body
LE: loop exit
PB: predicated region body
PF: predicated region fallthrough
CT: control target
= control target key end

     0   :  { %12 = vsyncpa [#allocation3], 0  ;;  %s1226_s0 = inlined_call_operand.vmem [shape: f32[4,256], index: 0, kind: input, shape index: {}]   ;;  %s1227_s1 = inlined_call_operand.hbm [shape: f32[32,4], index: 1, kind: input, shape index: {}]   ;;  %s1228_s2 = inlined_call_operand.hbm [shape: f32[32,1], index: 2, kind: input, shape index: {}]   ;;  %s1229_s3 = inlined_call_operand.hbm [shape: f32[32,32], index: 3, kind: input, shape index: {}]   ;;  %s1230_s4 = inlined_call_operand.hbm [shape: f32[32,1], index: 4, kind: input, shape index: {}]   ;;  %s1231_s5 = inlined_call_operand.vmem [shape: f32[8,32], index: 5, kind: input, shape index: {}]   ;;  %s1232_s6 = inlined_call_operand.vmem [shape: f32[8,1], index: 6, kind: input, shape index: {}]   ;;  %s1233_s7 = inlined_call_operand.vmem [shape: f32[8,256], index: 7, kind: output, shape index: {}]  }
   0x1   :  { %13 = vsyncpa [#allocation5], 0 }
   0x2   :  { %14 = vsyncpa [#allocation8], 0  ;;  %s1096_s24 = smov 0  }
   0x3 LB: > { %s1102_s25 = sadd.s32 4294967295, %s1045_s24   ;;  %p775_p0 = scmp.ge.s32.totalorder %s1045_s24, 1  ;;  %s1045_s24 = sphi %s1096_s24, %s20_s24  }
   0x4   : > { %p203_p1 = scmp.lt.s32.totalorder %s1045_s24, 3  ;;  %p880_p2 = scmp.eq.s32.totalorder %s1102_s25, 0 }
   0x5   : > { %s1047_s27 = smov [#allocation4]   ;;  %s1048_s29 = smov [#allocation2]  }
   0x6   : > { %p1107_p3 = pnand %p775_p0, %p203_p1  ;;  %s228_s28 = sshll.u32 %s1047_s27, 4  ;;  %s229_s28 = int_to_ptr.vmem [resolvable:$true] %s228_s28 }
   0x7   : > { %s215_s30 = sshll.u32 %s1048_s29, 4  ;;  %s1049_s9 = smov [#allocation6]   ;;  %s1113_s30 = int_to_ptr.vmem [resolvable:$true] %s215_s30 }
   0x8   : > { %p867_p4 = pneg %p1107_p3  ;;  %s241_s10 = sshll.u32 %s1049_s9, 4  ;;  %s1121_s10 = int_to_ptr.vmem [resolvable:$true] %s241_s10 }
   0x9   : > { %s1050_s11 = smov [#allocation7]   ;;  %s934_s13 = scalar_lea.vmem %s229_s28, 512 }
   0xa   : > { %p1117_p5 = pnand %p880_p2, %p867_p4  ;;  %s1123_s12 = sshll.u32 %s1050_s11, 4  ;;  %s255_s12 = int_to_ptr.vmem [resolvable:$true] %s1123_s12 }
   0xb   : > { %p935_p7 = scmp.ne.s32.totalorder %s229_s28, %s934_s13  ;;  %p942_p10 = scmp.lt.s32.totalorder %s229_s28, %s229_s28 }
   0xc   : > { %p925_p6 = pneg %p1117_p5  ;;  %p943_p11 = scmp.lt.s32.totalorder %s934_s13, %s934_s13 }
   0xe   : > { %p937_p8 = pnand %p935_p7, %p925_p6  ;;  %p944_p12 = por %p943_p11, %p942_p10 }
  0x10   : > { %p938_p9 = pneg %p937_p8 }
  0x12   : > { %p945_p13 = pnand %p944_p12, %p938_p9 }
  0x14   : > { %948 = shalt.err (!%p945_p13)
}
  0x15   : > { %s1051_s14 = smov 128   ;;  %s1052_s15 = smov 8  }
  0x16   : > { %873 = dma.hbm_to_vmem [thread:$0]  (!%p1117_p5), %s1228_s2, 512, %s229_s28, [#allocation5], %s1051_s14, %s1051_s14, %s1052_s15  }
  0x17   : > { %s960_s18 = scalar_lea.vmem %s1113_s30, 512  ;;  %p968_p7 = scmp.lt.s32.totalorder %s1113_s30, %s1113_s30 }
  0x18   : > { %p961_p0 = scmp.ne.s32.totalorder %s1113_s30, %s960_s18  ;;  %p969_p8 = scmp.lt.s32.totalorder %s960_s18, %s960_s18 }
  0x1a   : > { %p963_p1 = pnand %p961_p0, %p925_p6  ;;  %p970_p9 = por %p969_p8, %p968_p7 }
  0x1c   : > { %p964_p4 = pneg %p963_p1 }
  0x1e   : > { %p971_p10 = pnand %p970_p9, %p964_p4 }
  0x20   : > { %974 = shalt.err (!%p971_p10)
}
  0x21   : > { %870 = dma.hbm_to_vmem [thread:$0]  (!%p1117_p5), %s1227_s1, 512, %s1113_s30, [#allocation3], %s1051_s14, %s1051_s14, %s1052_s15  }
  0x22   : > { %s986_s21 = scalar_lea.vmem %s1121_s10, 512  ;;  %p994_p0 = scmp.lt.s32.totalorder %s1121_s10, %s1121_s10 }
  0x23   : > { %p987_p11 = scmp.ne.s32.totalorder %s1121_s10, %s986_s21  ;;  %p995_p1 = scmp.lt.s32.totalorder %s986_s21, %s986_s21 }
  0x25   : > { %p989_p12 = pnand %p987_p11, %p925_p6  ;;  %p996_p4 = por %p995_p1, %p994_p0 }
  0x27   : > { %p990_p13 = pneg %p989_p12 }
  0x29   : > { %p997_p7 = pnand %p996_p4, %p990_p13 }
  0x2b   : > { %1000 = shalt.err (!%p997_p7)
}
  0x2c   : > { %876 = dma.hbm_to_vmem [thread:$0]  (!%p1117_p5), %s1229_s3, 512, %s1121_s10, [#allocation5], %s1051_s14, %s1051_s14, %s1052_s15  }
  0x2d   : > { %s1012_s27 = scalar_lea.vmem %s255_s12, 512  ;;  %p1020_p11 = scmp.lt.s32.totalorder %s255_s12, %s255_s12 }
  0x2e   : > { %p1013_p8 = scmp.ne.s32.totalorder %s255_s12, %s1012_s27  ;;  %p1021_p12 = scmp.lt.s32.totalorder %s1012_s27, %s1012_s27 }
  0x30   : > { %p1015_p9 = pnand %p1013_p8, %p925_p6  ;;  %p1022_p13 = por %p1021_p12, %p1020_p11 }
  0x32   : > { %p1016_p10 = pneg %p1015_p9 }
  0x34   : > { %p1023_p0 = pnand %p1022_p13, %p1016_p10 }
  0x36   : > { %1026 = shalt.err (!%p1023_p0)
}
  0x37   : > { %879 = dma.hbm_to_vmem [thread:$0]  (!%p1117_p5), %s1230_s4, 512, %s255_s12, [#allocation8], %s1051_s14, %s1051_s14, %s1052_s15  }
  0x38   : > { %283 = sbr.rel (%p1107_p3) target bundleno = 711 (0x2c7), region = 48 }
  0x3d   : > { %1032 = dma.done.wait (%p880_p2), [#allocation3], 512  }
  0x3e   : > { %1034 = vsyncadd (%p880_p2), [#allocation3], 4294966784 }
  0x3f   : > { %1036 = dma.done.wait (%p880_p2), [#allocation5], 1024  }
  0x40   : > { %1038 = vsyncadd (%p880_p2), [#allocation5], 4294966272 }
  0x41   : > { %1040 = dma.done.wait (%p880_p2), [#allocation8], 512  }
  0x42   : > { %1042 = vsyncadd (%p880_p2), [#allocation8], 4294966784  ;;  %p325_p3 = scmp.lt.s32.totalorder %s1102_s25, 1  ;;  %v1053_v0 = vmov 0   ;;  %vm375_vm0 = vcmask 1043456   ;;  %vm362_vm1 = vcmask 31744  }
  0x43   : > { %905 = vset.pattern.permute.xlu0 %v1053_v0  ;;  %906 = vset.pattern.permute.xlu1 %v1053_v0  ;;  %v334_v2 = vld [vmem:[#allocation2] sm:$0xff]  ;;  %v335_v3 = vld [vmem:[#allocation2 + $0x8] sm:$0xff]  ;;  %v336_v4 = vld [vmem:[#allocation2 + $0x10] sm:$0xff]  ;;  %vm496_vm2 = vcmask 261120   ;;  %v1054_v35 = vmov 0.0   ;;  %vm1055_vm3 = vmmov 0  }
  0x44   : > { %s1237_s25 = smov (!%p325_p3, %s1102_s25), 1  ;;  %820 = vmatprep.mubr.msk.f32.mxu0 %vm362_vm1, %v334_v2  ;;  %v341_v5 = vld [vmem:[#allocation4 + $0x18] sm:$0xff]  ;;  %v339_v6 = vld [vmem:[#allocation4 + $0x8] sm:$0xff]  ;;  %v340_v7 = vld [vmem:[#allocation4 + $0x10] sm:$0xff] }
  0x45   : > { %s786_s26 = sshll.u32 %s1237_s25, 2  ;;  %359 = vperm.xlu0 %905, %v341_v5   ;;  %349 = vperm.xlu1 %906, %v339_v6   ;;  %v337_v8 = vld [vmem:[#allocation2 + $0x18] sm:$0xff]  ;;  %v338_v9 = vld [vmem:[#allocation4] sm:$0xff]  ;;  %v474_v11 = vld [vmem:[#allocation7 + $0x10] sm:$0xff]  ;;  %s787_s14 = sshll.u32 %s1237_s25, 3 }
  0x46   : > { %s328_s9 = scalar_lea.vmem %s1226_s0, %s786_s26  ;;  %v475_v10 = vld [vmem:[#allocation7 + $0x18] sm:$0xff]  ;;  %v473_v12 = vld [vmem:[#allocation7 + $0x8] sm:$0xff]  ;;  %v472_v13 = vld [vmem:[#allocation7] sm:$0xff]  ;;  %s332_s17 = scalar_lea.vmem %s1233_s7, %s787_s14 }
  0x47   : > { %v333_v1 = vld [vmem:[%s328_s9] sm:$0xf]  ;;  %v469_v32 = vld [vmem:[#allocation6 + $0x8] sm:$0xff]  ;;  %v470_v33 = vld [vmem:[#allocation6 + $0x10] sm:$0xff] }
  0x48   : > { %818 = vmatprep.subr.msk.mxu0 %vm375_vm0, %v333_v1  ;;  %v599_v14 = vld [vmem:[%s1232_s6] sm:$0xff]  ;;  %v471_v34 = vld [vmem:[#allocation6 + $0x18] sm:$0xff] }
  0x49   : > { %819 = vmatpush3.msk.msra.mxu0 %vm375_vm0, %v333_v1  ;;  %354 = vperm.xlu0 %905, %v340_v7   ;;  %v468_v15 = vld [vmem:[#allocation6] sm:$0xff] }
  0x4a   : > { %821 = vmatmul.mubr.msk.f32.vlgmr.msra.gmra.mxu0 %vm362_vm1, %v335_v3  ;;  %344 = vperm.xlu1 %906, %v338_v9   ;;  %v598_v51 = vld [vmem:[%s1231_s5] sm:$0xff] }
  0x4b   : > { %823 = vmatprep.mubr.msk.f32.mxu0 %vm362_vm1, %v336_v4  ;;  %834 = vmatprep.mubr.msk.f32.mxu1 %vm496_vm2, %v468_v15 }
  0x4c   : > { %840 = vmatprep.subr.mxu0 %v1054_v35 }
  0x4d   : > { %493 = vperm.xlu0 %905, %v475_v10  }
  0x4e   : > { %824 = vmatmul.mubr.msk.f32.gmra.mxu0 %vm362_vm1, %v337_v8  ;;  %488 = vperm.xlu1 %906, %v474_v11  }
  0x4f   : > { %848 = vmatprep.mubr.msk.f32.mxu0 %vm1055_vm3, %v1054_v35 }
  0x51   : > { %483 = vperm.xlu0 %905, %v473_v12  }
  0x52   : > { %478 = vperm.xlu1 %906, %v472_v13  }
  0x55   : > { %602 = vperm.xlu0 %905, %v599_v14  }
  0xc0   : > { %v360_v16 = vpop.permute.xlu0 %359  ;;  %v350_v18 = vpop.permute.xlu1 %349 }
  0xc4   : > { %v355_v22 = vpop.permute.xlu0 %354 }
  0xc5   : > { %v345_v26 = vpop.permute.xlu1 %344 }
  0xc8   : > { %v494_v36 = vpop.permute.xlu0 %493 }
  0xc9   : > { %v489_v38 = vpop.permute.xlu1 %488 }
  0xcc   : > { %v484_v42 = vpop.permute.xlu0 %483 }
  0xcd   : > { %v479_v46 = vpop.permute.xlu1 %478 }
  0xd0   : > { %v603_v53 = vpop.permute.xlu0 %602 }
 0x10a   : > { %v822_v17 = vpop.f32.mrf.mxu0 }
 0x10b   : > { %v451_v24 = vadd.f32 %v822_v17, %v350_v18 }
 0x10c   : > { %v445_v19 = vpop.f32.mrf.mxu0 }
 0x10d   : > { %v446_v27 = vadd.f32 %v445_v19, %v345_v26 }
 0x10e   : > { %v825_v20 = vpop.f32.mrf.mxu0 }
 0x10f   : > { %v461_v21 = vadd.f32 %v825_v20, %v360_v16 }
 0x110   : > { %v455_v23 = vpop.f32.mrf.mxu0 }
 0x111   : > { %907 = vtanh.f32 %v461_v21  ;;  %v456_v25 = vadd.f32 %v455_v23, %v355_v22 }
 0x113   : > { %909 = vtanh.f32 %v456_v25 }
 0x114   : > { %911 = vtanh.f32 %v451_v24 }
 0x115   : > { %913 = vtanh.f32 %v446_v27 }
 0x11e   : > { %v908_v28 = vpop.eup %907 }
 0x11f   : > { %826 = vmatprep.subr.mxu1 %v908_v28 }
 0x120   : > { %v910_v29 = vpop.eup %909  ;;  %827 = vmatpush3.msra.mxu1 %v908_v28 }
 0x121   : > { %828 = vmatprep.subr.mxu1 %v910_v29  ;;  %v912_v30 = vpop.eup %911 }
 0x122   : > { %829 = vmatpush3.msra.mxu1 %v910_v29  ;;  %v914_v31 = vpop.eup %913 }
 0x123   : > { %830 = vmatprep.subr.mxu1 %v912_v30 }
 0x124   : > { %831 = vmatpush3.msra.mxu1 %v912_v30 }
 0x125   : > { %832 = vmatprep.subr.mxu1 %v914_v31 }
 0x126   : > { %833 = vmatpush3.msra.mxu1 %v914_v31 }
 0x127   : > { %835 = vmatmul.mubr.msk.f32.vlgmr.msra.gmra.mxu1 %vm496_vm2, %v469_v32 }
 0x128   : > { %837 = vmatprep.mubr.msk.f32.mxu1 %vm496_vm2, %v470_v33 }
 0x12b   : > { %838 = vmatmul.mubr.msk.f32.gmra.mxu1 %vm496_vm2, %v471_v34 }
 0x1e7   : > { %v836_v37 = vpop.f32.mrf.mxu1 }
 0x1e8   : > { %v581_v44 = vadd.f32 %v836_v37, %v484_v42 }
 0x1e9   : > { %v575_v39 = vpop.f32.mrf.mxu1 }
 0x1ea   : > { %v576_v47 = vadd.f32 %v575_v39, %v479_v46 }
 0x1eb   : > { %v839_v40 = vpop.f32.mrf.mxu1 }
 0x1ec   : > { %v591_v41 = vadd.f32 %v839_v40, %v494_v36 }
 0x1ed   : > { %v585_v43 = vpop.f32.mrf.mxu1 }
 0x1ee   : > { %915 = vtanh.f32 %v591_v41  ;;  %v586_v45 = vadd.f32 %v585_v43, %v489_v38 }
 0x1f0   : > { %917 = vtanh.f32 %v586_v45 }
 0x1f1   : > { %919 = vtanh.f32 %v581_v44 }
 0x1f2   : > { %921 = vtanh.f32 %v576_v47 }
 0x1fb   : > { %v916_v48 = vpop.eup %915 }
 0x1fc   : > { %841 = vmatpush3.msra.mxu0 %v916_v48 }
 0x1fd   : > { %v918_v49 = vpop.eup %917  ;;  %842 = vmatprep.subr.mxu0 %v1054_v35 }
 0x1fe   : > { %843 = vmatpush3.msra.mxu0 %v918_v49  ;;  %v920_v50 = vpop.eup %919 }
 0x1ff   : > { %844 = vmatprep.subr.mxu0 %v1054_v35  ;;  %v922_v52 = vpop.eup %921 }
 0x200   : > { %845 = vmatpush3.msra.mxu0 %v920_v50 }
 0x201   : > { %846 = vmatprep.subr.mxu0 %v1054_v35 }
 0x202   : > { %847 = vmatpush3.msra.mxu0 %v922_v52 }
 0x203   : > { %849 = vmatmul.mubr.msk.f32.vlgmr.msra.gmra.mxu0 %vm496_vm2, %v598_v51 }
 0x2c3   : > { %v674_v54 = vpop.f32.mrf.mxu0 }
 0x2c4   : > { %v675_v55 = vadd.f32 %v674_v54, %v603_v53 }
 0x2c5   : > { %v850_v56 = vpop.f32.mrf.mxu0 }
 0x2c6   : > { %678 = vst [vmem:[%s332_s17] sm:$0xff] %v675_v55 }
 0x2c7 PF: > { %s20_s24 = sadd.s32 1, %s1045_s24  }
 0x2c8   : > { %p17_p2 = scmp.ge.s32.totalorder %s20_s24, 4  }
 0x2ca   :  { %19 = sbr.rel (!%p17_p2) target bundleno = 3 (0x3), region = 95 }
 0x2cf   :  { %698 = vsyncpa [#allocation3], 1 }
 0x2d0   :  { %700 = vsyncpa [#allocation3 + $0x1], 1 }
 0x2d1   :  { %701 = vsyncpa [#allocation5], 1 }
 0x2d2   :  { %702 = vsyncpa [#allocation8], 1 }

</bundles_post_ra>
